<compile_context>
chip_gen: v7x
topology: tpu7x:2x2x1
jax: 0.10.0
libtpu: 0.0.40
codegen_flags: <defaults>
</compile_context>

<pallas_src>
import functools

import jax
import jax.numpy as jnp
from jax.experimental import pallas as pl
from jax.experimental.pallas import tpu as pltpu


def _ce_kernel(tgt_ref, logits_ref, sum_ref, cnt_ref, sum_acc, cnt_acc, *,
               n_rows, seq_len, tm, n_inner, ignore_padding):
    """One (outer, inner) tile of tm rows: accumulate masked NLL sum & count."""
    j = pl.program_id(1)

    @pl.when(j == 0)
    def _():
        sum_acc[...] = jnp.zeros_like(sum_acc)
        cnt_acc[...] = jnp.zeros_like(cnt_acc)

    # Native-dtype DMA, f32 compute in-registers.
    logits = logits_ref[...].astype(jnp.float32)               # [tm, F]
    tgt = tgt_ref[...]                                          # [tm, 1] int32

    # log-sum-exp over the class (lane) axis; reuse shifted for the gather.
    m = jnp.max(logits, axis=-1, keepdims=True)                 # [tm, 1]
    shifted = logits - m                                        # [tm, F]
    # NOTE(perf): on v7x/bf16 the single EUP's exp throughput is the likely
    # floor; profile before trimming DMA/VALU further.
    sumexp = jnp.sum(jnp.exp(shifted), axis=-1, keepdims=True)  # [tm, 1]
    # (1, F) iota: broadcast happens inside the compare, not as a full-width op.
    cls = jax.lax.broadcasted_iota(jnp.int32, (1, logits.shape[-1]), 1)
    shifted_t = jnp.sum(jnp.where(cls == tgt, shifted, 0.0),
                        axis=-1, keepdims=True)                 # [tm, 1]
    # lse - logit_t == (log(sumexp) + m) - (shifted_t + m)
    per_row = jnp.log(sumexp) - shifted_t                       # [tm, 1]

    # In-kernel masking: ragged tail / phantom megacore block, position-0 skip,
    # ignore_index == 0.  Out-of-range targets are not detected (PyTorch would
    # raise); callers must provide t in [0, F).
    block_idx = pl.program_id(0) * n_inner + j
    row = block_idx * tm + jax.lax.broadcasted_iota(jnp.int32, (tm, 1), 0)
    pos = jnp.remainder(row, seq_len)
    valid = (row < n_rows) & (pos != 0)
    if ignore_padding:
        valid = valid & (tgt != 0)

    # Per-step work is just a VPU add; reduction deferred to the last step.
    sum_acc[...] += jnp.where(valid, per_row, 0.0)
    cnt_acc[...] += valid.astype(jnp.float32)

    @pl.when(j == pl.num_programs(1) - 1)
    def _():
        sum_ref[...] = jnp.sum(sum_acc[...]).reshape(1, 1, 1)
        cnt_ref[...] = jnp.sum(cnt_acc[...]).reshape(1, 1, 1)


def _round_up(x, m):
    return ((x + m - 1) // m) * m


def _vmem_capacity_bytes():
    """Physical VMEM per core; conservative 64 MiB (v7x) fallback."""
    try:
        info = pltpu.get_tpu_info()
        cap = getattr(info, "vmem_capacity_bytes", None)
        if cap:
            return int(cap)
    except Exception:
        pass
    return 64 * 1024 * 1024


def _choose_tm(n_rows, num_classes, itemsize, budget_bytes, *,
               min_tm=16, max_tm=8192):
    """Row-tile size under an explicit VMEM budget.

    Per-row VMEM cost model:
      2 * F * itemsize   double-buffered native logits input
      16 * F             ~4 live f32 intermediates (cast, shifted, exp, select)
      1024               (tm,1) int32 targets, lane-padded to 128, x2 buffers
      1024               two (tm,1) f32 scratch accumulators, lane-padded
    """
    per_row = num_classes * (2 * itemsize + 16) + 2048
    tm = budget_bytes // max(1, per_row)
    tm = int(min(max_tm, max(min_tm, tm)))
    tm = max(min_tm, (tm // 16) * 16)
    tm = min(tm, _round_up(n_rows, 16))
    return tm


@functools.partial(jax.jit, static_argnames=("ignore_padding", "tm"))
def pallas_cross_entropy(logits, targets, *, ignore_padding=True, tm=None):
    """Mean cross entropy over positions 1: of a [B, L, F] logits tensor.

    Matches nn.CrossEntropyLoss(ignore_index=0, reduction='mean') applied to
    logits[:, 1:, :] (class axis last) and targets[:, 1:].
    All-ignored batches yield NaN, same as PyTorch.
    """
    B, L, F = logits.shape
    N = B * L

    # Bitcast-equivalent reshapes only — no slicing / padding / dtype copies.
    x = logits.reshape(N, F)
    t = targets.reshape(N, 1).astype(jnp.int32)

    cap = _vmem_capacity_bytes()
    budget = int(cap * 0.6)                 # headroom for outputs + internals
    vmem_limit = int(cap * 0.85)
    if tm is None:
        tm = _choose_tm(N, F, x.dtype.itemsize, budget)

    n_blocks = -(-N // tm)
    # Megacore: shard row-block sweeps over a "parallel" outer axis.  Odd block
    # counts get a phantom trailing block (clamped index_map, masked in-kernel)
    # so v7x's two TensorCores are both used; neutral on v5e/v6e (single TC).
    n_outer = 2 if n_blocks >= 2 else 1
    n_inner = -(-n_blocks // n_outer)
    last_block = n_blocks - 1

    kernel = functools.partial(
        _ce_kernel, n_rows=N, seq_len=L, tm=tm, n_inner=n_inner,
        ignore_padding=ignore_padding)

    def in_map(o, i):
        return (jnp.minimum(o * n_inner + i, last_block), 0)

    s, c = pl.pallas_call(
        kernel,
        out_shape=(
            jax.ShapeDtypeStruct((n_outer, 1, 1), jnp.float32),
            jax.ShapeDtypeStruct((n_outer, 1, 1), jnp.float32),
        ),
        grid_spec=pltpu.PrefetchScalarGridSpec(
            num_scalar_prefetch=0,
            grid=(n_outer, n_inner),
            in_specs=[
                pl.BlockSpec((tm, 1), in_map),
                pl.BlockSpec((tm, F), in_map),
            ],
            out_specs=(
                pl.BlockSpec((1, 1, 1), lambda o, i: (o, 0, 0)),
                pl.BlockSpec((1, 1, 1), lambda o, i: (o, 0, 0)),
            ),
            scratch_shapes=[
                pltpu.VMEM((tm, 1), jnp.float32),   # running NLL sum per row
                pltpu.VMEM((tm, 1), jnp.float32),   # running valid count
            ],
        ),
        compiler_params=pltpu.CompilerParams(
            dimension_semantics=("parallel", "arbitrary"),
            vmem_limit_bytes=vmem_limit),
    )(t, x)

    return jnp.sum(s) / jnp.sum(c)


def collect_fcs_jax(model_out, target, str_to_int):
    """JAX port of collect_fcs (glue, not a hot path). jit-safe: no host sync."""
    B, L = target.shape
    F = model_out['1'].shape[2]
    embeds = jnp.zeros((B, L, F), dtype=jnp.float32)
    langs = target[:, 0]
    for key in model_out.keys():
        if key in str_to_int:
            sel = (langs == str_to_int[key])[:, None, None]
            embeds = jnp.where(sel, model_out[key].astype(jnp.float32), embeds)
    return embeds


class MultipleCrossEntropyLossPallas:
    """Pallas-backed equivalent of the PyTorch MultipleCrossEntropyLoss."""

    def __init__(self, multi_language=None, ignore_padding=True):
        self.metrics = {}
        self.multi_language = multi_language
        self.ignore_padding = ignore_padding
        self.str_to_int = {str(i): i for i in range(20)}

    def __call__(self, model_out, target_x):
        if self.multi_language is not None and self.multi_language in target_x:
            model_out[self.multi_language] = collect_fcs_jax(
                model_out, target_x[self.multi_language], self.str_to_int)
        # Launch all per-label kernels asynchronously; metrics stay on device
        # (no per-label float() host sync — readback, if needed, is caller's).
        loss = jnp.float32(0.0)
        metrics = {}
        for label, tgt in target_x.items():
            this_loss = pallas_cross_entropy(
                model_out[label], tgt, ignore_padding=self.ignore_padding)
            metrics[label] = this_loss
            loss = loss + this_loss
        self.metrics = metrics
        return loss


def _reference_loss_single(logits, tgt, ignore_padding=True):
    """Pure-JAX reference for one label."""
    lg = logits[:, 1:, :].astype(jnp.float32)
    t = tgt[:, 1:].astype(jnp.int32)
    logp = jax.nn.log_softmax(lg, axis=-1)
    nll = -jnp.take_along_axis(logp, t[..., None], axis=-1)[..., 0]
    mask = (t != 0).astype(jnp.float32) if ignore_padding \
        else jnp.ones_like(t, dtype=jnp.float32)
    return jnp.sum(nll * mask) / jnp.sum(mask)


if __name__ == "__main__":
    key = jax.random.PRNGKey(0)
    B, L = 2, 8
    # num_features differs per label; exercise both f32 and bf16 model outputs.
    feat = {"smiles": (12, jnp.float32), "props": (7, jnp.bfloat16)}

    k_iter = key
    model_out = {}
    target_x = {}
    for label, (F, dt) in feat.items():
        k_iter, k1, k2 = jax.random.split(k_iter, 3)
        model_out[label] = jax.random.normal(k1, (B, L, F)).astype(dt)
        # targets in [0, F); zeros act as ignored padding
        target_x[label] = jax.random.randint(k2, (B, L), 0, F, dtype=jnp.int32)

    loss_mod = MultipleCrossEntropyLossPallas(multi_language=None,
                                              ignore_padding=True)
    loss = loss_mod(model_out, target_x)
    loss = jax.block_until_ready(loss)

    ref = sum(_reference_loss_single(model_out[lbl], target_x[lbl])
              for lbl in target_x)
    ref = jax.block_until_ready(ref)
    assert abs(float(loss) - float(ref)) < 1e-3, (float(loss), float(ref))

    # Multi-block path: odd block count (3 blocks) + ragged trailing block ->
    # exercises the megacore split with a clamped phantom block.
    kb1, kb2 = jax.random.split(key)
    big_logits = jax.random.normal(kb1, (2, 21, 16), dtype=jnp.float32)
    big_tgt = jax.random.randint(kb2, (2, 21), 0, 16, dtype=jnp.int32)
    got = jax.block_until_ready(
        pallas_cross_entropy(big_logits, big_tgt, tm=16))
    ref2 = jax.block_until_ready(_reference_loss_single(big_logits, big_tgt))
    assert abs(float(got) - float(ref2)) < 1e-4, (float(got), float(ref2))

    # Even block count path (default adaptive tm collapses to one block here).
    got3 = jax.block_until_ready(pallas_cross_entropy(big_logits, big_tgt))
    assert abs(float(got3) - float(ref2)) < 1e-4, (float(got3), float(ref2))

    print("KERNEL_OK")
</pallas_src>

<mosaic_0001>
module attributes {stable_mosaic.version = 11 : i64} {
  func.func @_ce_kernel(%arg0: i32, %arg1: i32, %arg2: memref<16x1xi32, #tpu.memory_space<vmem>>, %arg3: memref<16x12xf32, #tpu.memory_space<vmem>>, %arg4: memref<1x1x1xf32, #tpu.memory_space<vmem>>, %arg5: memref<1x1x1xf32, #tpu.memory_space<vmem>>, %arg6: memref<16x1xf32, #tpu.memory_space<vmem>>, %arg7: memref<16x1xf32, #tpu.memory_space<vmem>>) attributes {dimension_semantics = [#tpu.dimension_semantics<parallel>, #tpu.dimension_semantics<arbitrary>], iteration_bounds = array<i64: 1, 1>, scalar_prefetch = 0 : i64, scratch_operands = 2 : i64, tpu.core_type = #tpu.core_type<tc>, window_params = [{transform_indices = @transform_0, window_bounds = array<i64: 16, 1>}, {transform_indices = @transform_1, window_bounds = array<i64: 16, 12>}, {transform_indices = @transform_2, window_bounds = array<i64: 1, 1, 1>}, {transform_indices = @transform_3, window_bounds = array<i64: 1, 1, 1>}]} {
    %c0_i32 = arith.constant 0 : i32
    %0 = arith.cmpi eq, %arg1, %c0_i32 : i32
    %1 = arith.extui %0 : i1 to i32
    %c0_i32_0 = arith.constant 0 : i32
    %2 = arith.cmpi ne, %1, %c0_i32_0 : i32
    scf.if %2 {
      %cst_26 = arith.constant 0.000000e+00 : f32
      %65 = vector.broadcast %cst_26 : f32 to vector<16x1xf32>
      %c0_27 = arith.constant 0 : index
      %c0_28 = arith.constant 0 : index
      %66 = vector.load %arg6[%c0_27, %c0_28] : memref<16x1xf32, #tpu.memory_space<vmem>>, vector<16x1xf32>
      tpu.vector_store %arg6[%c0_27, %c0_28], %65 {strides = array<i32>} : memref<16x1xf32, #tpu.memory_space<vmem>>, vector<16x1xf32>,
      %cst_29 = arith.constant 0.000000e+00 : f32
      %67 = vector.broadcast %cst_29 : f32 to vector<16x1xf32>
      %c0_30 = arith.constant 0 : index
      %c0_31 = arith.constant 0 : index
      %68 = vector.load %arg7[%c0_30, %c0_31] : memref<16x1xf32, #tpu.memory_space<vmem>>, vector<16x1xf32>
      tpu.vector_store %arg7[%c0_30, %c0_31], %67 {strides = array<i32>} : memref<16x1xf32, #tpu.memory_space<vmem>>, vector<16x1xf32>,
    } else {
    }
    %c0 = arith.constant 0 : index
    %c0_1 = arith.constant 0 : index
    %3 = vector.load %arg3[%c0, %c0_1] : memref<16x12xf32, #tpu.memory_space<vmem>>, vector<16x12xf32>
    %c0_2 = arith.constant 0 : index
    %c0_3 = arith.constant 0 : index
    %4 = vector.load %arg2[%c0_2, %c0_3] : memref<16x1xi32, #tpu.memory_space<vmem>>, vector<16x1xi32>
    %cst = arith.constant dense<0xFF800000> : vector<16xf32>
    %5 = vector.multi_reduction <maximumf>, %3, %cst [1] : vector<16x12xf32> to vector<16xf32>
    %6 = vector.shape_cast %5 : vector<16xf32> to vector<16x1xf32>
    %7 = vector.broadcast %6 : vector<16x1xf32> to vector<16x12xf32>
    %8 = arith.subf %3, %7 : vector<16x12xf32>
    %9 = math.exp %8 : vector<16x12xf32>
    %cst_4 = arith.constant dense<0.000000e+00> : vector<16xf32>
    %10 = vector.multi_reduction <add>, %9, %cst_4 [1] : vector<16x12xf32> to vector<16xf32>
    %11 = vector.shape_cast %10 : vector<16xf32> to vector<16x1xf32>
    %12 = tpu.iota {dimensions = array<i32: 1>} : vector<1x12xi32>
    %13 = vector.broadcast %12 : vector<1x12xi32> to vector<16x12xi32>
    %14 = vector.broadcast %4 : vector<16x1xi32> to vector<16x12xi32>
    %15 = arith.cmpi eq, %13, %14 : vector<16x12xi32>
    %cst_5 = arith.constant 0.000000e+00 : f32
    %16 = vector.broadcast %cst_5 : f32 to vector<16x12xf32>
    %17 = arith.select %15, %8, %16 : vector<16x12xi1>, vector<16x12xf32>
    %cst_6 = arith.constant dense<0.000000e+00> : vector<16xf32>
    %18 = vector.multi_reduction <add>, %17, %cst_6 [1] : vector<16x12xf32> to vector<16xf32>
    %19 = vector.shape_cast %18 : vector<16xf32> to vector<16x1xf32>
    %20 = math.log %11 : vector<16x1xf32>
    %21 = arith.subf %20, %19 : vector<16x1xf32>
    %c1_i32 = arith.constant 1 : i32
    %22 = arith.muli %arg0, %c1_i32 : i32
    %23 = arith.addi %22, %arg1 : i32
    %c16_i32 = arith.constant 16 : i32
    %24 = arith.muli %23, %c16_i32 : i32
    %25 = tpu.iota {dimensions = array<i32: 0>} : vector<16x1xi32>
    %26 = vector.broadcast %24 : i32 to vector<16x1xi32>
    %27 = arith.addi %26, %25 : vector<16x1xi32>
    %c8_i32 = arith.constant 8 : i32
    %c0_i32_7 = arith.constant 0 : i32
    %28 = arith.cmpi eq, %c8_i32, %c0_i32_7 : i32
    %c1_i32_8 = arith.constant 1 : i32
    %29 = arith.select %28, %c1_i32_8, %c8_i32 : i32
    %30 = vector.broadcast %29 : i32 to vector<16x1xi32>
    %31 = arith.remsi %27, %30 : vector<16x1xi32>
    %c0_i32_9 = arith.constant 0 : i32
    %32 = vector.broadcast %c0_i32_9 : i32 to vector<16x1xi32>
    %33 = arith.cmpi ne, %31, %32 : vector<16x1xi32>
    %c0_i32_10 = arith.constant 0 : i32
    %34 = vector.broadcast %c0_i32_10 : i32 to vector<16x1xi32>
    %35 = arith.cmpi slt, %31, %34 : vector<16x1xi32>
    %c0_i32_11 = arith.constant 0 : i32
    %36 = arith.cmpi slt, %29, %c0_i32_11 : i32
    %37 = vector.broadcast %36 : i1 to vector<16x1xi1>
    %38 = vector.broadcast %37 : vector<16x1xi1> to vector<16x1xi1>
    %39 = arith.xori %35, %38 : vector<16x1xi1>
    %40 = arith.andi %39, %33 : vector<16x1xi1>
    %41 = vector.broadcast %29 : i32 to vector<16x1xi32>
    %42 = arith.addi %31, %41 : vector<16x1xi32>
    %43 = arith.select %40, %42, %31 : vector<16x1xi1>, vector<16x1xi32>
    %c16_i32_12 = arith.constant 16 : i32
    %44 = vector.broadcast %c16_i32_12 : i32 to vector<16x1xi32>
    %45 = arith.cmpi slt, %27, %44 : vector<16x1xi32>
    %c0_i32_13 = arith.constant 0 : i32
    %46 = vector.broadcast %c0_i32_13 : i32 to vector<16x1xi32>
    %47 = arith.cmpi ne, %43, %46 : vector<16x1xi32>
    %48 = arith.andi %45, %47 : vector<16x1xi1>
    %c0_i32_14 = arith.constant 0 : i32
    %49 = vector.broadcast %c0_i32_14 : i32 to vector<16x1xi32>
    %50 = arith.cmpi ne, %4, %49 : vector<16x1xi32>
    %51 = arith.andi %48, %50 : vector<16x1xi1>
    %c0_15 = arith.constant 0 : index
    %c0_16 = arith.constant 0 : index
    %52 = vector.load %arg6[%c0_15, %c0_16] : memref<16x1xf32, #tpu.memory_space<vmem>>, vector<16x1xf32>
    %cst_17 = arith.constant 0.000000e+00 : f32
    %53 = vector.broadcast %cst_17 : f32 to vector<16x1xf32>
    %54 = arith.select %51, %21, %53 : vector<16x1xi1>, vector<16x1xf32>
    %55 = arith.addf %52, %54 : vector<16x1xf32>
    %c0_18 = arith.constant 0 : index
    %c0_19 = arith.constant 0 : index
    %56 = vector.load %arg6[%c0_18, %c0_19] : memref<16x1xf32, #tpu.memory_space<vmem>>, vector<16x1xf32>
    tpu.vector_store %arg6[%c0_18, %c0_19], %55 {strides = array<i32>} : memref<16x1xf32, #tpu.memory_space<vmem>>, vector<16x1xf32>,
    %c0_20 = arith.constant 0 : index
    %c0_21 = arith.constant 0 : index
    %57 = vector.load %arg7[%c0_20, %c0_21] : memref<16x1xf32, #tpu.memory_space<vmem>>, vector<16x1xf32>
    %58 = arith.extui %51 : vector<16x1xi1> to vector<16x1xi32>
    %59 = arith.sitofp %58 : vector<16x1xi32> to vector<16x1xf32>
    %60 = arith.addf %57, %59 : vector<16x1xf32>
    %c0_22 = arith.constant 0 : index
    %c0_23 = arith.constant 0 : index
    %61 = vector.load %arg7[%c0_22, %c0_23] : memref<16x1xf32, #tpu.memory_space<vmem>>, vector<16x1xf32>
    tpu.vector_store %arg7[%c0_22, %c0_23], %60 {strides = array<i32>} : memref<16x1xf32, #tpu.memory_space<vmem>>, vector<16x1xf32>,
    %c0_i32_24 = arith.constant 0 : i32
    %62 = arith.cmpi eq, %arg1, %c0_i32_24 : i32
    %63 = arith.extui %62 : i1 to i32
    %c0_i32_25 = arith.constant 0 : i32
    %64 = arith.cmpi ne, %63, %c0_i32_25 : i32
    scf.if %64 {
      %c0_26 = arith.constant 0 : index
      %c0_27 = arith.constant 0 : index
      %65 = vector.load %arg6[%c0_26, %c0_27] : memref<16x1xf32, #tpu.memory_space<vmem>>, vector<16x1xf32>
      %66 = vector.shape_cast %65 : vector<16x1xf32> to vector<1x16x1xf32>
      %cst_28 = arith.constant dense<0.000000e+00> : vector<1xf32>
      %67 = vector.multi_reduction <add>, %66, %cst_28 [1, 2] : vector<1x16x1xf32> to vector<1xf32>
      %68 = vector.shape_cast %67 : vector<1xf32> to vector<1x1x1xf32>
      %69 = vector.extract %68[0, 0, 0] : f32 from vector<1x1x1xf32>
      %70 = vector.broadcast %69 : f32 to vector<1x1x1xf32>
      %c0_29 = arith.constant 0 : index
      %c0_30 = arith.constant 0 : index
      %c0_31 = arith.constant 0 : index
      %71 = vector.load %arg4[%c0_29, %c0_30, %c0_31] : memref<1x1x1xf32, #tpu.memory_space<vmem>>, vector<1x1x1xf32>
      tpu.vector_store %arg4[%c0_29, %c0_30, %c0_31], %70 {strides = array<i32>} : memref<1x1x1xf32, #tpu.memory_space<vmem>>, vector<1x1x1xf32>,
      %c0_32 = arith.constant 0 : index
      %c0_33 = arith.constant 0 : index
      %72 = vector.load %arg7[%c0_32, %c0_33] : memref<16x1xf32, #tpu.memory_space<vmem>>, vector<16x1xf32>
      %73 = vector.shape_cast %72 : vector<16x1xf32> to vector<1x16x1xf32>
      %cst_34 = arith.constant dense<0.000000e+00> : vector<1xf32>
      %74 = vector.multi_reduction <add>, %73, %cst_34 [1, 2] : vector<1x16x1xf32> to vector<1xf32>
      %75 = vector.shape_cast %74 : vector<1xf32> to vector<1x1x1xf32>
      %76 = vector.extract %75[0, 0, 0] : f32 from vector<1x1x1xf32>
      %77 = vector.broadcast %76 : f32 to vector<1x1x1xf32>
      %c0_35 = arith.constant 0 : index
      %c0_36 = arith.constant 0 : index
      %c0_37 = arith.constant 0 : index
      %78 = vector.load %arg5[%c0_35, %c0_36, %c0_37] : memref<1x1x1xf32, #tpu.memory_space<vmem>>, vector<1x1x1xf32>
      tpu.vector_store %arg5[%c0_35, %c0_36, %c0_37], %77 {strides = array<i32>} : memref<1x1x1xf32, #tpu.memory_space<vmem>>, vector<1x1x1xf32>,
    } else {
    }
    return
  }
  func.func @transform_0(%arg0: i32, %arg1: i32) -> (i32, i32) {
    %c1_i32 = arith.constant 1 : i32
    %0 = arith.muli %arg0, %c1_i32 : i32
    %1 = arith.addi %0, %arg1 : i32
    %c0_i32 = arith.constant 0 : i32
    %2 = arith.minsi %1, %c0_i32 : i32
    %c0_i32_0 = arith.constant 0 : i32
    %c0_i32_1 = arith.constant 0 : i32
    return %2, %c0_i32_0 : i32, i32
  }
  func.func @transform_1(%arg0: i32, %arg1: i32) -> (i32, i32) {
    %c1_i32 = arith.constant 1 : i32
    %0 = arith.muli %arg0, %c1_i32 : i32
    %1 = arith.addi %0, %arg1 : i32
    %c0_i32 = arith.constant 0 : i32
    %2 = arith.minsi %1, %c0_i32 : i32
    %c0_i32_0 = arith.constant 0 : i32
    %c0_i32_1 = arith.constant 0 : i32
    return %2, %c0_i32_0 : i32, i32
  }
  func.func @transform_2(%arg0: i32, %arg1: i32) -> (i32, i32, i32) {
    %c0_i32 = arith.constant 0 : i32
    %c0_i32_0 = arith.constant 0 : i32
    %c0_i32_1 = arith.constant 0 : i32
    return %arg0, %c0_i32, %c0_i32_0 : i32, i32, i32
  }
  func.func @transform_3(%arg0: i32, %arg1: i32) -> (i32, i32, i32) {
    %c0_i32 = arith.constant 0 : i32
    %c0_i32_0 = arith.constant 0 : i32
    %c0_i32_1 = arith.constant 0 : i32
    return %arg0, %c0_i32, %c0_i32_0 : i32, i32, i32
  }
}

</mosaic_0001>

<bundles_post_ra>
// kernel: pallas_cross_entropy.1
= control target key start
LH: loop header
LB: loop body
LE: loop exit
PB: predicated region body
PF: predicated region fallthrough
CT: control target
= control target key end

     0   :  { %9 = vsyncpa [#allocation5], 0  ;;  %vm92_vm0 = vcmask 97280   ;;  %v111_v3 = vlaneseq  ;;  %vm83_vm1 = vcmask 7168   ;;  %v340_v5 = vmov 0   ;;  %s436_s0 = inlined_call_operand.vmem [shape: s32[16,1], index: 0, kind: input, shape index: {}]   ;;  %s437_s1 = inlined_call_operand.vmem [shape: f32[16,12], index: 1, kind: input, shape index: {}]   ;;  %s438_s2 = inlined_call_operand.hbm [shape: f32[1,1,1], index: 2, kind: output, shape index: {0}]   ;;  %s439_s3 = inlined_call_operand.hbm [shape: f32[1,1,1], index: 3, kind: output, shape index: {1}]  }
   0x1   :  { %v88_v0 = vld [vmem:[%s437_s1] sm:$0xff]  ;;  %v89_v1 = vld [vmem:[%s437_s1 + $0x8] sm:$0xff]  ;;  %282 = vset.pattern.permute.xlu1 %v340_v5  ;;  %283 = vset.pattern.permute.xlu0 %v340_v5  ;;  %v341_v7 = vmov 0.0  }
   0x2   :  { %v90_v2 = vld [vmem:[%s436_s0] sm:$0xff]  ;;  %v93_v4 = vsel %vm92_vm0, %v88_v0, -inf  ;;  %v138_v6 = vshrl.u32 %v111_v3, 7  ;;  %86 = vst.msk [vmem:[#allocation3] sm:$0xff] %vm83_vm1, %v341_v7  ;;  %84 = vst.msk [vmem:[#allocation2] sm:$0xff] %vm83_vm1, %v341_v7 }
   0x3   :  { %94 = vmax.xlane.f32.xlu0 %v93_v4  ;;  %114 = vperm.xlu1 %282, %v90_v2   ;;  %85 = vst.msk [vmem:[#allocation2 + $0x8] sm:$0xff] %vm83_vm1, %v341_v7  ;;  %87 = vst.msk [vmem:[#allocation3 + $0x8] sm:$0xff] %vm83_vm1, %v341_v7 }
   0x4   :  { %10 = vsyncpa [#allocation7], 0  ;;  %v96_v8 = vsel %vm92_vm0, %v89_v1, -inf  ;;  %v91_v9 = vld [vmem:[%s436_s0 + $0x8] sm:$0xff]  ;;  %v147_v10 = vand.u32 7, %v138_v6  ;;  %vm173_vm2 = vcmp.ne.s32.totalorder %v90_v2, 0 }
   0x5   :  { %v112_v22 = vand.u32 127, %v111_v3  ;;  %v139_v32 = vadd.s32 8, %v138_v6  ;;  %vm174_vm7 = vcmp.ne.s32.totalorder %v91_v9, 0  ;;  %s342_s0 = smov [#allocation4]   ;;  %vm214_vm10 = vcmask 0   ;;  %s343_s21 = smov [#allocation6]  }
   0x6   :  { %vm169_vm3 = vcmp.ne.s32.totalorder %v147_v10, 0  ;;  %s238_s19 = sshll.u32 %s342_s0, 4  ;;  %s248_s22 = sshll.u32 %s343_s21, 4  ;;  %s239_s19 = int_to_ptr.vmem [resolvable:$true] %s238_s19  ;;  %s249_s22 = int_to_ptr.vmem [resolvable:$true] %s248_s22 }
   0x7   :  { %97 = vmax.xlane.f32.xlu0 %v96_v8  ;;  %117 = vperm.xlu1 %282, %v91_v9   ;;  %vm382_vm4 = vmand %vm169_vm3, %vm173_vm2  ;;  %v154_v33 = vand.u32 7, %v139_v32  ;;  %s292_s23 = scalar_lea.vmem %s239_s19, 16  ;;  %s296_s24 = scalar_lea.vmem %s239_s19, 32 }
   0x8   :  { %v272_v12 = vsel %vm382_vm4, 1.0, %v341_v7  ;;  %p293_p0 = scmp.ne.s32.totalorder %s239_s19, %s292_s23  ;;  %p297_p1 = scmp.lt.s32.totalorder %s239_s19, %s239_s19 }
   0x9   :  { %v186_v13 = vld [vmem:[#allocation3] sm:$0xff]  ;;  %vm170_vm8 = vcmp.ne.s32.totalorder %v154_v33, 0  ;;  %v177_v44 = vld [vmem:[#allocation2] sm:$0xff]  ;;  %p298_p2 = scmp.lt.s32.totalorder %s296_s24, %s292_s23 }
   0xa   :  { %v192_v14 = vadd.f32 %v272_v12, %v186_v13  ;;  %vm393_vm9 = vmand %vm170_vm8, %vm174_vm7  ;;  %v187_v35 = vld [vmem:[#allocation3 + $0x8] sm:$0xff]  ;;  %v178_v51 = vld [vmem:[#allocation2 + $0x8] sm:$0xff] }
   0xb   :  { %v273_v36 = vsel %vm393_vm9, 1.0, %v341_v7  ;;  %p299_p3 = por %p298_p2, %p297_p1 }
   0xc   :  { %194 = vst.msk [vmem:[#allocation3] sm:$0xff] %vm83_vm1, %v192_v14  ;;  %v193_v37 = vadd.f32 %v273_v36, %v187_v35 }
   0xd   :  { %p300_p4 = pnand %p299_p3, %p293_p0 }
   0xe   :  { %195 = vst.msk [vmem:[#allocation3 + $0x8] sm:$0xff] %vm83_vm1, %v193_v37 }
  0x13   :  { %v216_v55 = vld [vmem:[#allocation3] sm:$0xff] }
  0x14   :  { %v218_v60 = vsel %vm83_vm1, %v216_v55, 0.0 }
  0x15   :  { %v217_v56 = vld [vmem:[#allocation3 + $0x8] sm:$0xff] }
  0x16   :  { %v219_v61 = vsel %vm83_vm1, %v217_v56, 0.0 }
  0x17   :  { %v220_v63 = vadd.f32 %v219_v61, %v218_v60 }
  0x82   :  { %v115_v21 = vpop.permute.xlu1 %114 }
  0x83   :  { %vm119_vm5 = vcmp.eq.s32.totalorder %v112_v22, %v115_v21 }
  0x86   :  { %v118_v24 = vpop.permute.xlu1 %117 }
  0x87   :  { %vm120_vm6 = vcmp.eq.s32.totalorder %v112_v22, %v118_v24 }
  0x90   :  { %v95_v15 = vpop.xlane.xlu0 %94 }
  0x91   :  { %v99_v16 = vsub.f32 %v88_v0, %v95_v15 }
  0x93   :  { %v101_v17 = vmul.f32 1.442695, %v99_v16  ;;  %v121_v26 = vsel %vm119_vm5, %v99_v16, 0.0 }
  0x94   :  { %v98_v18 = vpop.xlane.xlu0 %97  ;;  %v123_v28 = vsel %vm92_vm0, %v121_v26, 0.0 }
  0x95   :  { %284 = vpow2.f32 %v101_v17  ;;  %v100_v19 = vsub.f32 %v89_v1, %v98_v18 }
  0x97   :  { %v103_v20 = vmul.f32 1.442695, %v100_v19  ;;  %v122_v30 = vsel %vm120_vm6, %v100_v19, 0.0 }
  0x98   :  { %v126_v31 = vsel %vm92_vm0, %v122_v30, 0.0 }
  0x99   :  { %286 = vpow2.f32 %v103_v20 }
  0x9f   :  { %v285_v23 = vpop.eup %284 }
  0xa0   :  { %v105_v25 = vsel %vm92_vm0, %v285_v23, 0.0 }
  0xa1   :  { %106 = vadd.xlane.f32.xlu0 %v105_v25 }
  0xa3   :  { %v287_v27 = vpop.eup %286 }
  0xa4   :  { %v108_v29 = vsel %vm92_vm0, %v287_v27, 0.0 }
  0xa5   :  { %124 = vadd.xlane.f32.xlu0 %v123_v28  ;;  %109 = vadd.xlane.f32.xlu1 %v108_v29 }
  0xa9   :  { %127 = vadd.xlane.f32.xlu0 %v126_v31 }
 0x12e   :  { %v107_v38 = vpop.xlane.xlu0 %106 }
 0x12f   :  { %288 = vlog2.f32 %v107_v38 }
 0x132   :  { %v110_v39 = vpop.xlane.xlu1 %109  ;;  %v125_v41 = vpop.xlane.xlu0 %124 }
 0x133   :  { %290 = vlog2.f32 %v110_v39 }
 0x136   :  { %v128_v49 = vpop.xlane.xlu0 %127 }
 0x139   :  { %v289_v40 = vpop.eup %288 }
 0x13a   :  { %v130_v42 = vmul.f32 0.6931472, %v289_v40 }
 0x13c   :  { %v133_v43 = vsub.f32 %v130_v42, %v125_v41 }
 0x13d   :  { %v291_v45 = vpop.eup %290 }
 0x13e   :  { %v179_v46 = vsel %vm382_vm4, %v133_v43, 0.0  ;;  %v132_v47 = vmul.f32 0.6931472, %v291_v45 }
 0x13f   :  { %v181_v48 = vadd.f32 %v179_v46, %v177_v44 }
 0x140   :  { %v134_v50 = vsub.f32 %v132_v47, %v128_v49 }
 0x141   :  { %184 = vst.msk [vmem:[#allocation2] sm:$0xff] %vm83_vm1, %v181_v48 }
 0x142   :  { %v180_v52 = vsel %vm393_vm9, %v134_v50, 0.0 }
 0x143   :  { %v182_v53 = vadd.f32 %v180_v52, %v178_v51 }
 0x145   :  { %185 = vst.msk [vmem:[#allocation2 + $0x8] sm:$0xff] %vm83_vm1, %v182_v53 }
 0x148   :  { %v199_v54 = vld [vmem:[#allocation2] sm:$0xff] }
 0x149   :  { %v201_v58 = vsel %vm83_vm1, %v199_v54, 0.0 }
 0x14c   :  { %v200_v57 = vld [vmem:[#allocation2 + $0x8] sm:$0xff] }
 0x14d   :  { %v202_v59 = vsel %vm83_vm1, %v200_v57, 0.0 }
 0x14e   :  { %v203_v62 = vadd.f32 %v202_v59, %v201_v58 }
 0x150   :  { %204 = vadd.xlane.f32.xlu0 %v203_v62 }
 0x154   :  { %221 = vadd.xlane.f32.xlu0 %v220_v63 }
 0x1dd   :  { %v205_v0 = vpop.xlane.xlu0 %204 }
 0x1de   :  { %v206_v1 = vrot.slane %v205_v0, 4 }
 0x1e0   :  { %v207_v2 = vadd.f32 %v206_v1, %v205_v0 }
 0x1e1   :  { %v222_v3 = vpop.xlane.xlu0 %221 }
 0x1e2   :  { %v208_v4 = vrot.slane %v207_v2, 2  ;;  %v223_v5 = vrot.slane %v222_v3, 4 }
 0x1e4   :  { %v224_v6 = vadd.f32 %v223_v5, %v222_v3  ;;  %v209_v7 = vadd.f32 %v208_v4, %v207_v2 }
 0x1e6   :  { %v225_v8 = vrot.slane %v224_v6, 2  ;;  %v210_v9 = vrot.slane %v209_v7, 1 }
 0x1e8   :  { %v226_v10 = vadd.f32 %v225_v8, %v224_v6  ;;  %v211_v11 = vadd.f32 %v210_v9, %v209_v7 }
 0x1ea   :  { %274 = vpush %v211_v11  ;;  %v227_v12 = vrot.slane %v226_v10, 1 }
 0x1ec   :  { %v228_v13 = vadd.f32 %v227_v12, %v226_v10 }
 0x1ee   :  { %276 = vpush %v228_v13 }
 0x21b   :  { %s275_s20 = spop %274 }
 0x21c   :  { %v213_v14 = vstv %s275_s20 }
 0x21d   :  { %215 = vst.msk [vmem:[#allocation4] sm:$0x1] %vm214_vm10, %v213_v14 }
 0x21e   :  { %303 = shalt.err (!%p300_p4)
}
 0x21f   :  { %s304_s27 = scalar_lea.hbm %s438_s2, 16 }
 0x220   :  { %p305_p5 = scmp.ne.s32.totalorder %s438_s2, %s304_s27  ;;  %p308_p6 = scmp.lt.u32.totalorder %s304_s27, %s438_s2 }
 0x222   :  { %p310_p7 = pnand %p308_p6, %p305_p5 }
 0x224   :  { %313 = shalt.err (!%p310_p7)
}
 0x225   :  { %241 = dma.vmem_to_hbm [thread:$0]  %s239_s19, 16, %s438_s2, [#allocation5]  }
 0x226   :  { %s277_s7 = spop %276  ;;  %s314_s8 = scalar_lea.vmem %s249_s22, 16 }
 0x227   :  { %v230_v15 = vstv %s277_s7  ;;  %p315_p8 = scmp.ne.s32.totalorder %s249_s22, %s314_s8  ;;  %s318_s9 = scalar_lea.vmem %s249_s22, 32 }
 0x228   :  { %231 = vst.msk [vmem:[#allocation6] sm:$0x1] %vm214_vm10, %v230_v15  ;;  %p319_p9 = scmp.lt.s32.totalorder %s249_s22, %s249_s22  ;;  %p320_p10 = scmp.lt.s32.totalorder %s318_s9, %s314_s8 }
 0x22a   :  { %p321_p11 = por %p320_p10, %p319_p9 }
 0x22c   :  { %p322_p12 = pnand %p321_p11, %p315_p8 }
 0x22e   :  { %325 = shalt.err (!%p322_p12)
}
 0x22f   :  { %s326_s12 = scalar_lea.hbm %s439_s3, 16 }
 0x230   :  { %p327_p13 = scmp.ne.s32.totalorder %s439_s3, %s326_s12  ;;  %p330_p0 = scmp.lt.u32.totalorder %s326_s12, %s439_s3 }
 0x232   :  { %p332_p1 = pnand %p330_p0, %p327_p13 }
 0x234   :  { %335 = shalt.err (!%p332_p1)
}
 0x235   :  { %251 = dma.vmem_to_hbm [thread:$0]  %s249_s22, 16, %s439_s3, [#allocation7]  }
 0x236   :  { %336 = dma.done.wait [#allocation5], 16  }
 0x237   :  { %337 = vsyncadd [#allocation5], 4294967280 }
 0x238   :  { %338 = dma.done.wait [#allocation7], 16  }
 0x239   :  { %339 = vsyncadd [#allocation7], 4294967280 }
 0x23a   :  { %258 = vsyncpa [#allocation5], 1 }
 0x23b   :  { %259 = vsyncpa [#allocation7], 1 }

</bundles_post_ra>
